<compile_context>
chip_gen: v7x
topology: tpu7x:2x2x1
jax: 0.10.0
libtpu: 0.0.40
codegen_flags: <defaults>
</compile_context>

<pallas_src>
import jax
import jax.numpy as jnp
from jax.experimental import pallas as pl
from jax.experimental.pallas import tpu as pltpu

# Model dims (small, consistent with the TextRNN example but TPU-friendly)
N_CLASS = 16     # vocab size / input_size / output size
N_HIDDEN = 32    # RNN hidden size
SEQ_LEN = 8
BATCH = 4


def textrnn_kernel(x2d_ref, h0_ref, wpack_ref, bpack_ref, out_ref):
    """Full forward pass in VMEM.

    x2d_ref:   (seq*batch, n_class) f32, TIME-MAJOR (row block t = timestep t)
    h0_ref:    (batch, n_hidden)    f32
    wpack_ref: (n_class + 2*n_hidden, n_hidden) bf16 packed weights:
                 rows [0:C)        = W_ih^T            (C, H)
                 rows [C:C+H)      = W_hh^T            (H, H)
                 rows [C+H:C+2H)   = W^T lane-padded   (H, H), cols >= C are 0
    bpack_ref: (2, n_hidden) f32 packed biases:
                 row 0 = b_ih + b_hh
                 row 1 = [b_out, 0...] (cols >= C are 0)
    out_ref:   (batch, n_class) f32
    """
    seq_batch, n_class = x2d_ref.shape
    batch, n_hidden = h0_ref.shape
    seq = seq_batch // batch

    # Static slices of the packed parameter slabs (bf16 rows are 16-aligned).
    wih_t = wpack_ref[0:n_class, :]                          # (C, H) bf16
    whh_t = wpack_ref[n_class:n_class + n_hidden, :]         # (H, H) bf16
    w_t = wpack_ref[n_class + n_hidden:, :]                  # (H, H) bf16, padded
    rnn_bias = bpack_ref[0:1, :]                             # (1, H) f32
    out_bias = bpack_ref[1:2, :]                             # (1, H) f32, padded

    # Hoisted input projection for ALL timesteps: one bf16 MXU matmul with f32
    # accumulation, combined RNN bias folded in once. Stays an in-register
    # value (no VMEM scratch round-trip).
    xp = (jnp.dot(x2d_ref[...].astype(jnp.bfloat16), wih_t,
                  preferred_element_type=jnp.float32)
          + rnn_bias)                                        # (seq*batch, H) f32

    # Serial recurrence, fully unrolled (seq is a compile-time constant).
    # Per step only the dependent h @ W_hh^T matmul + add + tanh remain;
    # per-step xp blocks are contiguous rows (time-major).
    h = h0_ref[...]                                          # (batch, H) f32
    for t in range(seq):
        h = jnp.tanh(xp[t * batch:(t + 1) * batch, :]
                     + jnp.dot(h.astype(jnp.bfloat16), whh_t,
                               preferred_element_type=jnp.float32))

    # Readout: out = h_T @ W^T + b.  Padded columns (>= n_class) are exactly
    # zero in both W^T and b_out, and are sliced away before the store.
    full = (jnp.dot(h.astype(jnp.bfloat16), w_t,
                    preferred_element_type=jnp.float32)
            + out_bias)                                      # (batch, H) f32
    out_ref[...] = full[:, :n_class]


def prepare_params(params):
    """Transpose / combine / pack parameters ONCE (not per forward call)."""
    w_ih, w_hh, b_ih, b_hh, w_out, b_out = params
    n_hidden = w_hh.shape[0]
    n_class = w_ih.shape[1]

    # bf16 weight slab: [W_ih^T ; W_hh^T ; W^T lane-padded to n_hidden cols]
    w_t_pad = jnp.zeros((n_hidden, n_hidden), jnp.float32).at[:, :n_class].set(w_out.T)
    wpack = jnp.concatenate([w_ih.T, w_hh.T, w_t_pad], axis=0).astype(jnp.bfloat16)

    # f32 bias slab: row 0 = combined RNN bias, row 1 = lane-padded output bias.
    bias0 = b_ih + b_hh
    bias1 = jnp.zeros((n_hidden,), jnp.float32).at[:n_class].set(b_out)
    bpack = jnp.stack([bias0, bias1], axis=0)
    return wpack, bpack


def textrnn_forward(hidden, X, prepared):
    """hidden: (1, batch, n_hidden) like nn.RNN; X: (batch, seq, n_class)."""
    wpack, bpack = prepared
    h0 = hidden[0]                                           # (batch, n_hidden)
    batch, seq, n_class = X.shape

    # Time-major flatten in the wrapper (mirrors PyTorch's X.transpose(0, 1));
    # the DMA then lands a plain 2D tile and the kernel needs no reshape.
    x2d = jnp.transpose(X, (1, 0, 2)).reshape(seq * batch, n_class)

    vmem = pl.BlockSpec(memory_space=pltpu.MemorySpace.VMEM)
    out = pl.pallas_call(
        textrnn_kernel,
        out_shape=jax.ShapeDtypeStruct((batch, n_class), jnp.float32),
        in_specs=[vmem] * 4,
        out_specs=vmem,
    )(x2d, h0, wpack, bpack)
    return out


def init_params(key):
    """Deterministic init; matches PyTorch shapes (uniform +- 1/sqrt(hidden))."""
    k1, k2, k3, k4, k5 = jax.random.split(key, 5)
    bound = 1.0 / jnp.sqrt(jnp.float32(N_HIDDEN))
    w_ih = jax.random.uniform(k1, (N_HIDDEN, N_CLASS), jnp.float32, -bound, bound)
    w_hh = jax.random.uniform(k2, (N_HIDDEN, N_HIDDEN), jnp.float32, -bound, bound)
    b_ih = jax.random.uniform(k3, (N_HIDDEN,), jnp.float32, -bound, bound)
    b_hh = jax.random.uniform(k4, (N_HIDDEN,), jnp.float32, -bound, bound)
    w_out = jax.random.uniform(k5, (N_CLASS, N_HIDDEN), jnp.float32, -bound, bound)
    b_out = jnp.ones((N_CLASS,), jnp.float32)    # nn.Parameter(torch.ones([n_class]))
    return (w_ih, w_hh, b_ih, b_hh, w_out, b_out)


def textrnn_reference(hidden, X, params):
    """Pure-JAX f32 reference of the PyTorch forward, for correctness check."""
    w_ih, w_hh, b_ih, b_hh, w_out, b_out = params
    x_t = jnp.transpose(X, (1, 0, 2))
    h = hidden[0]
    for t in range(x_t.shape[0]):
        h = jnp.tanh(x_t[t] @ w_ih.T + b_ih + h @ w_hh.T + b_hh)
    return h @ w_out.T + b_out


if __name__ == "__main__":
    key = jax.random.PRNGKey(0)
    kp, kx, kh = jax.random.split(key, 3)
    params = init_params(kp)
    prepared = prepare_params(params)            # one-time layout/pack prep

    X = jax.random.normal(kx, (BATCH, SEQ_LEN, N_CLASS), jnp.float32)
    hidden = jax.random.normal(kh, (1, BATCH, N_HIDDEN), jnp.float32)

    out = textrnn_forward(hidden, X, prepared)
    out = jax.block_until_ready(out)

    ref = textrnn_reference(hidden, X, params)
    assert out.shape == (BATCH, N_CLASS)
    # Tolerance loosened vs. the all-f32 version: matmul operands are bf16
    # (f32 accumulation), per the performance review.
    assert jnp.allclose(out, ref, atol=5e-2, rtol=5e-2), (
        f"max abs err = {jnp.max(jnp.abs(out - ref))}")
    print("KERNEL_OK")
</pallas_src>

<mosaic_0001>
module attributes {stable_mosaic.version = 11 : i64} {
  func.func @textrnn_kernel(%arg0: memref<32x16xf32, #tpu.memory_space<vmem>>, %arg1: memref<4x32xf32, #tpu.memory_space<vmem>>, %arg2: memref<80x32xbf16, #tpu.memory_space<vmem>>, %arg3: memref<2x32xf32, #tpu.memory_space<vmem>>, %arg4: memref<4x16xf32, #tpu.memory_space<vmem>>) attributes {dimension_semantics = [], scalar_prefetch = 0 : i64, scratch_operands = 0 : i64, tpu.core_type = #tpu.core_type<tc>} {
    %c0 = arith.constant 0 : index
    %c0_0 = arith.constant 0 : index
    %0 = vector.load %arg2[%c0, %c0_0] : memref<80x32xbf16, #tpu.memory_space<vmem>>, vector<16x32xbf16>
    %c16 = arith.constant 16 : index
    %c0_1 = arith.constant 0 : index
    %1 = vector.load %arg2[%c16, %c0_1] : memref<80x32xbf16, #tpu.memory_space<vmem>>, vector<32x32xbf16>
    %c48 = arith.constant 48 : index
    %c0_2 = arith.constant 0 : index
    %2 = vector.load %arg2[%c48, %c0_2] : memref<80x32xbf16, #tpu.memory_space<vmem>>, vector<32x32xbf16>
    %c0_3 = arith.constant 0 : index
    %c0_4 = arith.constant 0 : index
    %3 = vector.load %arg3[%c0_3, %c0_4] : memref<2x32xf32, #tpu.memory_space<vmem>>, vector<1x32xf32>
    %c1 = arith.constant 1 : index
    %c0_5 = arith.constant 0 : index
    %4 = vector.load %arg3[%c1, %c0_5] : memref<2x32xf32, #tpu.memory_space<vmem>>, vector<1x32xf32>
    %c0_6 = arith.constant 0 : index
    %c0_7 = arith.constant 0 : index
    %5 = vector.load %arg0[%c0_6, %c0_7] : memref<32x16xf32, #tpu.memory_space<vmem>>, vector<32x16xf32>
    %6 = arith.truncf %5 : vector<32x16xf32> to vector<32x16xbf16>
    %cst = arith.constant dense<0.000000e+00> : vector<32x32xf32>
    %7 = tpu.matmul %6, %0, %cst {dimension_numbers = #tpu.dot_dimension_numbers<[1], [0], [0], [1], [0, 0, 1, 1], [], []>} : vector<32x16xbf16>, vector<16x32xbf16>, vector<32x32xf32> -> vector<32x32xf32>
    %8 = vector.broadcast %3 : vector<1x32xf32> to vector<32x32xf32>
    %9 = arith.addf %7, %8 : vector<32x32xf32>
    %c0_8 = arith.constant 0 : index
    %c0_9 = arith.constant 0 : index
    %10 = vector.load %arg1[%c0_8, %c0_9] : memref<4x32xf32, #tpu.memory_space<vmem>>, vector<4x32xf32>
    %11 = vector.extract_strided_slice %9 {offsets = [0, 0], sizes = [4, 32], strides = [1, 1]} : vector<32x32xf32> to vector<4x32xf32>
    %12 = arith.truncf %10 : vector<4x32xf32> to vector<4x32xbf16>
    %cst_10 = arith.constant dense<0.000000e+00> : vector<4x32xf32>
    %13 = tpu.matmul %12, %1, %cst_10 {dimension_numbers = #tpu.dot_dimension_numbers<[1], [0], [0], [1], [0, 0, 1, 1], [], []>} : vector<4x32xbf16>, vector<32x32xbf16>, vector<4x32xf32> -> vector<4x32xf32>
    %14 = arith.addf %11, %13 : vector<4x32xf32>
    %15 = math.tanh %14 : vector<4x32xf32>
    %16 = vector.extract_strided_slice %9 {offsets = [4, 0], sizes = [4, 32], strides = [1, 1]} : vector<32x32xf32> to vector<4x32xf32>
    %17 = arith.truncf %15 : vector<4x32xf32> to vector<4x32xbf16>
    %cst_11 = arith.constant dense<0.000000e+00> : vector<4x32xf32>
    %18 = tpu.matmul %17, %1, %cst_11 {dimension_numbers = #tpu.dot_dimension_numbers<[1], [0], [0], [1], [0, 0, 1, 1], [], []>} : vector<4x32xbf16>, vector<32x32xbf16>, vector<4x32xf32> -> vector<4x32xf32>
    %19 = arith.addf %16, %18 : vector<4x32xf32>
    %20 = math.tanh %19 : vector<4x32xf32>
    %21 = vector.extract_strided_slice %9 {offsets = [8, 0], sizes = [4, 32], strides = [1, 1]} : vector<32x32xf32> to vector<4x32xf32>
    %22 = arith.truncf %20 : vector<4x32xf32> to vector<4x32xbf16>
    %cst_12 = arith.constant dense<0.000000e+00> : vector<4x32xf32>
    %23 = tpu.matmul %22, %1, %cst_12 {dimension_numbers = #tpu.dot_dimension_numbers<[1], [0], [0], [1], [0, 0, 1, 1], [], []>} : vector<4x32xbf16>, vector<32x32xbf16>, vector<4x32xf32> -> vector<4x32xf32>
    %24 = arith.addf %21, %23 : vector<4x32xf32>
    %25 = math.tanh %24 : vector<4x32xf32>
    %26 = vector.extract_strided_slice %9 {offsets = [12, 0], sizes = [4, 32], strides = [1, 1]} : vector<32x32xf32> to vector<4x32xf32>
    %27 = arith.truncf %25 : vector<4x32xf32> to vector<4x32xbf16>
    %cst_13 = arith.constant dense<0.000000e+00> : vector<4x32xf32>
    %28 = tpu.matmul %27, %1, %cst_13 {dimension_numbers = #tpu.dot_dimension_numbers<[1], [0], [0], [1], [0, 0, 1, 1], [], []>} : vector<4x32xbf16>, vector<32x32xbf16>, vector<4x32xf32> -> vector<4x32xf32>
    %29 = arith.addf %26, %28 : vector<4x32xf32>
    %30 = math.tanh %29 : vector<4x32xf32>
    %31 = vector.extract_strided_slice %9 {offsets = [16, 0], sizes = [4, 32], strides = [1, 1]} : vector<32x32xf32> to vector<4x32xf32>
    %32 = arith.truncf %30 : vector<4x32xf32> to vector<4x32xbf16>
    %cst_14 = arith.constant dense<0.000000e+00> : vector<4x32xf32>
    %33 = tpu.matmul %32, %1, %cst_14 {dimension_numbers = #tpu.dot_dimension_numbers<[1], [0], [0], [1], [0, 0, 1, 1], [], []>} : vector<4x32xbf16>, vector<32x32xbf16>, vector<4x32xf32> -> vector<4x32xf32>
    %34 = arith.addf %31, %33 : vector<4x32xf32>
    %35 = math.tanh %34 : vector<4x32xf32>
    %36 = vector.extract_strided_slice %9 {offsets = [20, 0], sizes = [4, 32], strides = [1, 1]} : vector<32x32xf32> to vector<4x32xf32>
    %37 = arith.truncf %35 : vector<4x32xf32> to vector<4x32xbf16>
    %cst_15 = arith.constant dense<0.000000e+00> : vector<4x32xf32>
    %38 = tpu.matmul %37, %1, %cst_15 {dimension_numbers = #tpu.dot_dimension_numbers<[1], [0], [0], [1], [0, 0, 1, 1], [], []>} : vector<4x32xbf16>, vector<32x32xbf16>, vector<4x32xf32> -> vector<4x32xf32>
    %39 = arith.addf %36, %38 : vector<4x32xf32>
    %40 = math.tanh %39 : vector<4x32xf32>
    %41 = vector.extract_strided_slice %9 {offsets = [24, 0], sizes = [4, 32], strides = [1, 1]} : vector<32x32xf32> to vector<4x32xf32>
    %42 = arith.truncf %40 : vector<4x32xf32> to vector<4x32xbf16>
    %cst_16 = arith.constant dense<0.000000e+00> : vector<4x32xf32>
    %43 = tpu.matmul %42, %1, %cst_16 {dimension_numbers = #tpu.dot_dimension_numbers<[1], [0], [0], [1], [0, 0, 1, 1], [], []>} : vector<4x32xbf16>, vector<32x32xbf16>, vector<4x32xf32> -> vector<4x32xf32>
    %44 = arith.addf %41, %43 : vector<4x32xf32>
    %45 = math.tanh %44 : vector<4x32xf32>
    %46 = vector.extract_strided_slice %9 {offsets = [28, 0], sizes = [4, 32], strides = [1, 1]} : vector<32x32xf32> to vector<4x32xf32>
    %47 = arith.truncf %45 : vector<4x32xf32> to vector<4x32xbf16>
    %cst_17 = arith.constant dense<0.000000e+00> : vector<4x32xf32>
    %48 = tpu.matmul %47, %1, %cst_17 {dimension_numbers = #tpu.dot_dimension_numbers<[1], [0], [0], [1], [0, 0, 1, 1], [], []>} : vector<4x32xbf16>, vector<32x32xbf16>, vector<4x32xf32> -> vector<4x32xf32>
    %49 = arith.addf %46, %48 : vector<4x32xf32>
    %50 = math.tanh %49 : vector<4x32xf32>
    %51 = arith.truncf %50 : vector<4x32xf32> to vector<4x32xbf16>
    %cst_18 = arith.constant dense<0.000000e+00> : vector<4x32xf32>
    %52 = tpu.matmul %51, %2, %cst_18 {dimension_numbers = #tpu.dot_dimension_numbers<[1], [0], [0], [1], [0, 0, 1, 1], [], []>} : vector<4x32xbf16>, vector<32x32xbf16>, vector<4x32xf32> -> vector<4x32xf32>
    %53 = vector.broadcast %4 : vector<1x32xf32> to vector<4x32xf32>
    %54 = arith.addf %52, %53 : vector<4x32xf32>
    %55 = vector.extract_strided_slice %54 {offsets = [0, 0], sizes = [4, 16], strides = [1, 1]} : vector<4x32xf32> to vector<4x16xf32>
    %c0_19 = arith.constant 0 : index
    %c0_20 = arith.constant 0 : index
    %56 = vector.load %arg4[%c0_19, %c0_20] : memref<4x16xf32, #tpu.memory_space<vmem>>, vector<4x16xf32>
    tpu.vector_store %arg4[%c0_19, %c0_20], %55 {strides = array<i32>} : memref<4x16xf32, #tpu.memory_space<vmem>>, vector<4x16xf32>,
    return
  }
}

</mosaic_0001>

<bundles_post_ra>
// kernel: tpu_custom_call.1
= control target key start
LH: loop header
LB: loop body
LE: loop exit
PB: predicated region body
PF: predicated region fallthrough
CT: control target
= control target key end

     0   :  { %v755_v1 = vmov 0.0   ;;  %vm47_vm0 = vcmask 130048   ;;  %vm756_vm1 = vmmov 0   ;;  %s904_s0 = inlined_call_operand.vmem [shape: f32[32,16], index: 0, kind: input, shape index: {}]   ;;  %s905_s1 = inlined_call_operand.vmem [shape: f32[4,32], index: 1, kind: input, shape index: {}]   ;;  %s906_s2 = inlined_call_operand.vmem [shape: bf16[80,32], index: 2, kind: input, shape index: {}]   ;;  %s907_s3 = inlined_call_operand.vmem [shape: f32[2,32], index: 3, kind: input, shape index: {}]   ;;  %s908_s4 = inlined_call_operand.hbm [shape: f32[4,16], index: 4, kind: output, shape index: {}]  }
   0x1   :  { %v710_v0 = vld [vmem:[%s906_s2] sm:$0xff]   ;;  %635 = vmatprep.subr.bf16.mxu1 %v755_v1  ;;  %v790_v2 = vld [vmem:[%s906_s2 + $0x8] sm:$0xff]   ;;  %v33_v5 = vld [vmem:[%s904_s0 + $0x10] sm:$0xff]  ;;  %639 = vmatprep.mubr.msk.bf16.mxu1 %vm756_vm1, %v755_v1 }
   0x2   :  { %629 = vmatprep.subr.bf16.mxu0 %v710_v0  ;;  %v31_v3 = vld [vmem:[%s904_s0] sm:$0xff]  ;;  %v32_v4 = vld [vmem:[%s904_s0 + $0x8] sm:$0xff]  ;;  %636 = vmatpush3.bf16.msra.mxu1 %v790_v2  ;;  %v34_v7 = vld [vmem:[%s904_s0 + $0x18] sm:$0xff] }
   0x3   :  { %630 = vmatpush3.bf16.msra.mxu0 %v710_v0  ;;  %v35_v6 = vpack.c.bf16 %v32_v4, %v31_v3  ;;  %637 = vmatprep.subr.bf16.mxu1 %v755_v1  ;;  %v36_v8 = vpack.c.bf16 %v34_v7, %v33_v5  ;;  %v809_v9 = vld [vmem:[%s906_s2 + $0x10] sm:$0xff]   ;;  %v103_v10 = vld [vmem:[%s905_s1] sm:$0xf] }
   0x4   :  { %643 = vmatprep.subr.bf16.mxu0 %v755_v1  ;;  %v104_v11 = vpack.c.bf16 %v103_v10, %v103_v10 }
   0x5   :  { %631 = vmatprep.mubr.msk.bf16.mxu0 %vm47_vm0, %v35_v6 }
   0x6   :  { %632 = vmatmul.mubr.msk.bf16.vlgmr.msra.gmra.mrb[0].mxu0 %vm47_vm0, %v36_v8 }
   0x7   :  { %9 = vsyncpa [#allocation3], 0  ;;  %638 = vmatpush3.bf16.msra.mxu1 %v809_v9  ;;  %vm117_vm2 = vcmask 261120   ;;  %644 = vmatpush3.bf16.msra.mxu0 %v790_v2  ;;  %v581_v12 = vld [vmem:[%s907_s3] ss:$0 sm:$0xff]  ;;  %s757_s11 = smov [#allocation2]  }
   0x8   :  { %645 = vmatprep.subr.bf16.mxu0 %v755_v1  ;;  %647 = vmatprep.mubr.msk.bf16.mxu0 %vm756_vm1, %v755_v1  ;;  %vm565_vm3 = vcmask 125952  }
   0x9   :  { %651 = vmatprep.subr.bf16.mxu1 %v755_v1 }
   0xa   :  { %640 = vmatmul.mubr.msk.bf16.vlgmr.msra.gmra.mrb[0].mxu1 %vm117_vm2, %v104_v11 }
   0xb   :  { %646 = vmatpush3.bf16.msra.mxu0 %v809_v9  ;;  %652 = vmatpush3.bf16.msra.mxu1 %v790_v2 }
   0xc   :  { %653 = vmatprep.subr.bf16.mxu1 %v755_v1  ;;  %655 = vmatprep.mubr.msk.bf16.mxu1 %vm756_vm1, %v755_v1 }
   0xd   :  { %659 = vmatprep.subr.bf16.mxu0 %v755_v1 }
   0xf   :  { %654 = vmatpush3.bf16.msra.mxu1 %v809_v9 }
  0x10   :  { %667 = vmatprep.subr.bf16.mxu1 %v755_v1 }
  0xd9   :  { %v633_v13 = vpop.f32.mrb[0].mxu0 }
  0xda   :  { %v835_v14 = vadd.f32 %v633_v13, %v581_v12  ;;  %v88_v15 = vpop.f32.mrb[1].mxu0  ;;  %v713_v13 = vld [vmem:[%s906_s2 + $0x18] sm:$0xff]  }
  0xdb   :  { %v89_v16 = vadd.f32 %v581_v12, %v88_v15  ;;  %v634_v17 = vpop.f32.mrb[2].mxu0 }
  0xdc   :  { %v837_v18 = vadd.f32 %v634_v17, %v581_v12  ;;  %v91_v19 = vpop.f32.mrb[3].mxu0 }
  0xdd   :  { %v92_v20 = vadd.f32 %v581_v12, %v91_v19  ;;  %v155_v21 = vpop.f32.mrb[0].mxu1 }
  0xde   :  { %v161_v22 = vadd.f32 %v155_v21, %v89_v16  ;;  %v641_v23 = vpop.f32.mrb[1].mxu1 }
  0xdf   :  { %v158_v24 = vpop.f32.mrb[2].mxu1 }
  0xe0   :  { %715 = vtanh.f32 %v161_v22  ;;  %v642_v25 = vpop.f32.mrb[3].mxu1 }
  0xea   :  { %v716_v26 = vpop.eup %715 }
  0xeb   :  { %v163_v27 = vpack.c.bf16 %v716_v26, %v716_v26 }
  0xed   :  { %648 = vmatmul.mubr.msk.bf16.vlgmr.msra.gmra.mrb[4].mxu0 %vm117_vm2, %v163_v27 }
  0xee   :  { %660 = vmatpush3.bf16.msra.mxu0 %v790_v2  ;;  %663 = vmatprep.mubr.msk.bf16.mxu0 %vm756_vm1, %v755_v1 }
  0xef   :  { %661 = vmatprep.subr.bf16.mxu0 %v755_v1 }
  0xf2   :  { %662 = vmatpush3.bf16.msra.mxu0 %v809_v9 }
  0xf3   :  { %675 = vmatprep.subr.bf16.mxu0 %v755_v1 }
 0x1c0   :  { %v201_v28 = vpop.f32.mrb[4].mxu0 }
 0x1c1   :  { %v208_v29 = vrot.slane %v201_v28, 4  ;;  %v649_v30 = vpop.f32.mrb[5].mxu0 }
 0x1c2   :  { %v204_v31 = vpop.f32.mrb[6].mxu0 }
 0x1c3   :  { %v210_v32 = vadd.f32 %v208_v29, %v89_v16  ;;  %v650_v33 = vpop.f32.mrb[7].mxu0 }
 0x1c5   :  { %717 = vtanh.f32 %v210_v32 }
 0x1cf   :  { %v718_v34 = vpop.eup %717 }
 0x1d0   :  { %v212_v35 = vpack.c.bf16 %v718_v34, %v718_v34 }
 0x1d2   :  { %v214_v36 = vrot.slane %v212_v35, 2 }
 0x1d4   :  { %656 = vmatmul.mubr.msk.bf16.vlgmr.msra.gmra.mrb[4].mxu1 %vm117_vm2, %v214_v36 }
 0x1d5   :  { %668 = vmatpush3.bf16.msra.mxu1 %v790_v2  ;;  %671 = vmatprep.mubr.msk.bf16.mxu1 %vm756_vm1, %v755_v1 }
 0x1d6   :  { %669 = vmatprep.subr.bf16.mxu1 %v755_v1 }
 0x1d9   :  { %670 = vmatpush3.bf16.msra.mxu1 %v809_v9 }
 0x1da   :  { %683 = vmatprep.subr.bf16.mxu1 %v755_v1 }
 0x2a7   :  { %v252_v37 = vpop.f32.mrb[4].mxu1 }
 0x2a8   :  { %v258_v38 = vadd.f32 %v252_v37, %v92_v20  ;;  %v657_v39 = vpop.f32.mrb[5].mxu1 }
 0x2a9   :  { %v255_v40 = vpop.f32.mrb[6].mxu1 }
 0x2aa   :  { %719 = vtanh.f32 %v258_v38  ;;  %v658_v41 = vpop.f32.mrb[7].mxu1 }
 0x2b4   :  { %v720_v42 = vpop.eup %719 }
 0x2b5   :  { %v260_v43 = vpack.c.bf16 %v720_v42, %v720_v42 }
 0x2b7   :  { %664 = vmatmul.mubr.msk.bf16.vlgmr.msra.gmra.mrb[8].mxu0 %vm117_vm2, %v260_v43 }
 0x2b8   :  { %676 = vmatpush3.bf16.msra.mxu0 %v790_v2  ;;  %679 = vmatprep.mubr.msk.bf16.mxu0 %vm756_vm1, %v755_v1 }
 0x2b9   :  { %677 = vmatprep.subr.bf16.mxu0 %v755_v1 }
 0x2bc   :  { %678 = vmatpush3.bf16.msra.mxu0 %v809_v9 }
 0x2bd   :  { %691 = vmatprep.subr.bf16.mxu0 %v755_v1 }
 0x38a   :  { %v298_v44 = vpop.f32.mrb[8].mxu0 }
 0x38b   :  { %v305_v45 = vrot.slane %v298_v44, 4  ;;  %v665_v46 = vpop.f32.mrb[9].mxu0 }
 0x38c   :  { %v301_v47 = vpop.f32.mrb[10].mxu0 }
 0x38d   :  { %v307_v48 = vadd.f32 %v305_v45, %v92_v20  ;;  %v666_v49 = vpop.f32.mrb[11].mxu0 }
 0x38f   :  { %721 = vtanh.f32 %v307_v48 }
 0x399   :  { %v722_v50 = vpop.eup %721 }
 0x39a   :  { %v309_v51 = vpack.c.bf16 %v722_v50, %v722_v50 }
 0x39c   :  { %v311_v52 = vrot.slane %v309_v51, 2 }
 0x39e   :  { %672 = vmatmul.mubr.msk.bf16.vlgmr.msra.gmra.mrb[8].mxu1 %vm117_vm2, %v311_v52 }
 0x39f   :  { %684 = vmatpush3.bf16.msra.mxu1 %v790_v2  ;;  %687 = vmatprep.mubr.msk.bf16.mxu1 %vm756_vm1, %v755_v1 }
 0x3a0   :  { %685 = vmatprep.subr.bf16.mxu1 %v755_v1 }
 0x3a3   :  { %686 = vmatpush3.bf16.msra.mxu1 %v809_v9 }
 0x3a4   :  { %699 = vmatprep.subr.bf16.mxu1 %v755_v1 }
 0x471   :  { %v349_v53 = vpop.f32.mrb[8].mxu1 }
 0x472   :  { %v355_v54 = vadd.f32 %v349_v53, %v835_v14  ;;  %v673_v55 = vpop.f32.mrb[9].mxu1 }
 0x473   :  { %v352_v56 = vpop.f32.mrb[10].mxu1 }
 0x474   :  { %723 = vtanh.f32 %v355_v54  ;;  %v674_v57 = vpop.f32.mrb[11].mxu1 }
 0x47e   :  { %v724_v58 = vpop.eup %723 }
 0x47f   :  { %v357_v59 = vpack.c.bf16 %v724_v58, %v724_v58 }
 0x481   :  { %680 = vmatmul.mubr.msk.bf16.vlgmr.msra.gmra.mrb[12].mxu0 %vm117_vm2, %v357_v59 }
 0x482   :  { %692 = vmatpush3.bf16.msra.mxu0 %v790_v2  ;;  %695 = vmatprep.mubr.msk.bf16.mxu0 %vm756_vm1, %v755_v1 }
 0x483   :  { %693 = vmatprep.subr.bf16.mxu0 %v755_v1 }
 0x486   :  { %694 = vmatpush3.bf16.msra.mxu0 %v809_v9 }
 0x554   :  { %v395_v60 = vpop.f32.mrb[12].mxu0 }
 0x555   :  { %v402_v61 = vrot.slane %v395_v60, 4  ;;  %v681_v62 = vpop.f32.mrb[13].mxu0 }
 0x556   :  { %v398_v63 = vpop.f32.mrb[14].mxu0 }
 0x557   :  { %v404_v0 = vadd.f32 %v402_v61, %v835_v14  ;;  %v682_v3 = vpop.f32.mrb[15].mxu0  ;;  %v714_v14 = vld [vmem:[%s906_s2 + $0x20] sm:$0xff]   ;;  %s573_s2 = sshll.u32 %s757_s11, 4  ;;  %s574_s2 = int_to_ptr.vmem [resolvable:$true] %s573_s2 }
 0x558   :  { %s731_s12 = scalar_lea.vmem %s574_s2, 64  ;;  %p736_p1 = scmp.lt.s32.totalorder %s574_s2, %s574_s2 }
 0x559   :  { %725 = vtanh.f32 %v404_v0  ;;  %p732_p0 = scmp.ne.s32.totalorder %s574_s2, %s731_s12  ;;  %p737_p2 = scmp.lt.s32.totalorder %s731_s12, %s731_s12 }
 0x55b   :  { %p738_p3 = por %p737_p2, %p736_p1 }
 0x55d   :  { %p739_p4 = pnand %p738_p3, %p732_p0 }
 0x563   :  { %v726_v4 = vpop.eup %725 }
 0x564   :  { %v406_v5 = vpack.c.bf16 %v726_v4, %v726_v4 }
 0x566   :  { %v408_v6 = vrot.slane %v406_v5, 2 }
 0x568   :  { %688 = vmatmul.mubr.msk.bf16.vlgmr.msra.gmra.mrb[12].mxu1 %vm117_vm2, %v408_v6 }
 0x569   :  { %703 = vmatprep.mubr.msk.bf16.mxu1 %vm756_vm1, %v755_v1  ;;  %700 = vmatpush3.bf16.msra.mxu1 %v713_v13 }
 0x56a   :  { %701 = vmatprep.subr.bf16.mxu1 %v755_v1  ;;  %v595_v1 = vld [vmem:[%s907_s3 + $0x1] ss:$0 sm:$0xff] }
 0x56d   :  { %702 = vmatpush3.bf16.msra.mxu1 %v714_v14 }
 0x63b   :  { %v446_v2 = vpop.f32.mrb[12].mxu1 }
 0x63c   :  { %v452_v7 = vadd.f32 %v446_v2, %v837_v18  ;;  %v689_v8 = vpop.f32.mrb[13].mxu1 }
 0x63d   :  { %v449_v9 = vpop.f32.mrb[14].mxu1 }
 0x63e   :  { %727 = vtanh.f32 %v452_v7  ;;  %v690_v10 = vpop.f32.mrb[15].mxu1 }
 0x648   :  { %v728_v11 = vpop.eup %727 }
 0x649   :  { %v454_v12 = vpack.c.bf16 %v728_v11, %v728_v11 }
 0x64b   :  { %696 = vmatmul.mubr.msk.bf16.vlgmr.msra.gmra.mrb[16].mxu0 %vm117_vm2, %v454_v12 }
 0x71e   :  { %v492_v15 = vpop.f32.mrb[16].mxu0 }
 0x71f   :  { %v499_v16 = vrot.slane %v492_v15, 4  ;;  %v697_v17 = vpop.f32.mrb[17].mxu0 }
 0x720   :  { %v495_v19 = vpop.f32.mrb[18].mxu0 }
 0x721   :  { %v501_v20 = vadd.f32 %v499_v16, %v837_v18  ;;  %v698_v21 = vpop.f32.mrb[19].mxu0 }
 0x723   :  { %729 = vtanh.f32 %v501_v20 }
 0x72d   :  { %v730_v22 = vpop.eup %729 }
 0x72e   :  { %v503_v23 = vpack.c.bf16 %v730_v22, %v730_v22 }
 0x730   :  { %v509_v24 = vrot.slane %v503_v23, 2 }
 0x732   :  { %704 = vmatmul.mubr.msk.bf16.vlgmr.msra.gmra.mrb[16].mxu1 %vm117_vm2, %v509_v24 }
 0x805   :  { %v559_v25 = vpop.f32.mrb[16].mxu1 }
 0x806   :  { %v560_v26 = vadd.f32 %v595_v1, %v559_v25  ;;  %v705_v27 = vpop.f32.mrb[17].mxu1 }
 0x807   :  { %v562_v28 = vpop.f32.mrb[18].mxu1 }
 0x808   :  { %v706_v18 = vpop.f32.mrb[19].mxu1  ;;  %566 = vst.msk [vmem:[#allocation2] sm:$0xf] %vm565_vm3, %v560_v26 }
 0x809   :  { %742 = shalt.err (!%p739_p4)
}
 0x80a   :  { %s743_s3 = scalar_lea.hbm %s908_s4, 64 }
 0x80b   :  { %p744_p5 = scmp.ne.s32.totalorder %s908_s4, %s743_s3  ;;  %p747_p6 = scmp.lt.u32.totalorder %s743_s3, %s908_s4 }
 0x80d   :  { %p749_p7 = pnand %p747_p6, %p744_p5 }
 0x80f   :  { %752 = shalt.err (!%p749_p7)
}
 0x810   :  { %576 = dma.vmem_to_hbm [thread:$0]  %s574_s2, 64, %s908_s4, [#allocation3]  }
 0x811   :  { %753 = dma.done.wait [#allocation3], 64  }
 0x812   :  { %754 = vsyncadd [#allocation3], 4294967232 }
 0x813   :  { %580 = vsyncpa [#allocation3], 1 }

</bundles_post_ra>
